<compile_context>
chip_gen: v7x
topology: tpu7x:2x2x1
jax: 0.10.0
libtpu: 0.0.40
codegen_flags: <defaults>
</compile_context>

<pallas_src>
import functools

import numpy as np
import jax
import jax.numpy as jnp
from jax.experimental import pallas as pl
from jax.experimental.pallas import tpu as pltpu

EPS = 1e-6


def get_manifold_e_by_tau(taus, tau_w=100):
    Es = np.floor(tau_w / taus).astype(np.int32)
    Es = np.where(Es % 2 == 0, Es - 1, Es)
    return Es


def _gelu(x):
    # tanh-approx GELU: tanh runs on the EUP slot instead of ~12 VALU ops/elem for an
    # erf polynomial.  NOTE: differs from torch's exact erf-GELU by ~1e-3 abs.
    c = 0.7978845608028654  # sqrt(2/pi)
    return 0.5 * x * (1.0 + jnp.tanh(c * (x + 0.044715 * (x * x * x))))


# ----------------------------------------------------------------------------
# Fused kernel: conv/proj GEMM + Pearson + mix + out-proj, Bt batches per step.
# Grid = (G, steps): outer axis "parallel" (megacore on v7x), inner axis "arbitrary"
# (carries the resident Pearson-sum accumulator).
# ----------------------------------------------------------------------------
def _mme_fused_kernel(x_ref, weff_ref, pb_ref, t_ref, wout_ref, bout_ref,
                      out_ref, corr_ref, *, compute_dtype):
    # x_ref:    (Bt, N, L*H)  f32   (cast to bf16 in-kernel)
    # weff_ref: (L*H, S*D)    bf16
    # pb_ref:   (1, S*D)      f32
    # t_ref:    (Bt, N, L)    f32
    # wout_ref: (S*D, C)      bf16
    # bout_ref: (1, C)        f32
    # out_ref:  (Bt, N, C)    f32
    # corr_ref: (1, N, N)     f32 accumulator (block index constant across inner axis)
    j = pl.program_id(1)
    Bt, N, LH = x_ref.shape
    C = wout_ref.shape[-1]

    # ---- fused dilated-conv + Linear(L_out->1) + GELU for ALL spaces & batches:
    # one (Bt*N, L*H) x (L*H, S*D) GEMM keeps the MXU rows fed.
    x_slab = x_ref[...].reshape(Bt * N, LH).astype(compute_dtype)   # in-kernel bf16 cast
    conv = jnp.dot(x_slab, weff_ref[...], preferred_element_type=jnp.float32)
    conv_x = _gelu(conv + pb_ref[...])                              # (Bt*N, S*D) f32

    # ---- reassociated output projection: z = conv_x @ wout_big FIRST, so the per-batch
    # pc matmul below only has C (not S*D) output columns.  (mean over spaces is folded
    # into wout_big in the wrapper.)
    z = jnp.dot(conv_x.astype(compute_dtype), wout_ref[...],
                preferred_element_type=jnp.float32).reshape(Bt, N, C)

    # ---- Pearson correlation per batch, fully in f32 (matches torch's f32 corr):
    # rows are pre-normalized by rsqrt(sum(vx^2)+eps) so pc = vxn @ vxn^T directly.
    t = t_ref[...]                                                  # (Bt, N, L) f32
    vx = t - jnp.mean(t, axis=-1, keepdims=True)
    inv = jax.lax.rsqrt(jnp.sum(vx * vx, axis=-1, keepdims=True) + EPS)   # (Bt,N,1) EUP
    vxn = vx * inv
    pc = jnp.einsum('bnl,bml->bnm', vxn, vxn,
                    preferred_element_type=jnp.float32)             # (Bt, N, N) f32

    # ---- accumulate raw batch-sum of pearson (1/B applied once in the wrapper);
    # direct write on the first inner step, += afterwards.
    pc_sum = jnp.sum(pc, axis=0, keepdims=True)                     # (1, N, N)

    @pl.when(j == 0)
    def _():
        corr_ref[...] = pc_sum

    @pl.when(j > 0)
    def _():
        corr_ref[...] += pc_sum

    # ---- mix + bias + GELU (f32; only C output columns so MXU cost is negligible)
    y = jnp.einsum('bnm,bmc->bnc', pc, z,
                   preferred_element_type=jnp.float32)              # (Bt, N, C)
    out_ref[...] = _gelu(y + bout_ref[...])
    # TODO(synk): when N*C >= 128, emit the per-step output as a lane-dense (Bt, N*C)
    #             slab (reshape in the wrapper) to avoid masked vst on the C<128 minor
    #             dim; at these shapes the full-minor-dims 3-D block is the safe choice
    #             w.r.t. the (8,128) block-tiling rule.


# ----------------------------------------------------------------------------
# Wrapper helpers
# ----------------------------------------------------------------------------
def _build_effective_weights(spaces, L, H):
    """Fold Conv1d taps and the Linear(L_out->1) projection into one (L*H, S*D) weight."""
    weffs, pbs = [], []
    for p in spaces:
        tau, E = p["tau"], p["E"]
        L_out = L - tau * (E - 1)
        d_model = p["conv_w"].shape[-1]
        pw = p["pw"]                                                    # (1, L_out)
        w_eff = jnp.zeros((L, H, d_model), jnp.float32)
        for k in range(E):  # static tiny loop (E <= ~5)
            contrib = pw[0, :, None, None] * p["conv_w"][k][None, :, :]  # (L_out, H, D)
            w_eff = w_eff.at[k * tau: k * tau + L_out].add(contrib)
        weffs.append(w_eff.reshape(L * H, d_model))
        pbs.append(jnp.broadcast_to(p["pb"], (1, d_model)))
    return jnp.concatenate(weffs, axis=-1), jnp.concatenate(pbs, axis=-1)


def _device_kind():
    try:
        return jax.devices()[0].device_kind.lower().replace(" ", "")
    except Exception:
        return ""


def _is_v7x():
    k = _device_kind()
    return ("v7" in k) or ("tpu7" in k)


def _num_tensorcores():
    # Only v7x exposes 2 TensorCores to a single Pallas grid; on v5e/v6e a G=2 split
    # would just duplicate the corr accumulator with zero parallelism gained.
    return 2 if _is_v7x() else 1


def _vmem_capacity_bytes():
    try:
        return int(pltpu.get_tpu_info().vmem_capacity_bytes)
    except Exception:
        return (64 << 20) if _is_v7x() else (128 << 20)


def _choose_bt(BperG, N, L, H, SD, C, vmem_budget, max_block_batch=None):
    """Largest divisor of BperG whose per-step live set fits the VMEM budget."""
    LH = L * H
    cap = BperG if max_block_batch is None else min(BperG, max(1, int(max_block_batch)))
    best = 1
    for bt in range(1, cap + 1):
        if BperG % bt:
            continue
        if bt * N > 2048:            # per-step rows: amortization saturates beyond this
            break
        io = 2 * 4 * bt * N * (LH + L + C)                       # double-buffered x/t/out (f32)
        tmp = 4 * bt * N * (LH // 2 + 3 * SD + 2 * L + N + 3 * C)  # rough in-kernel temporaries
        fixed = 2 * (LH * SD + SD * C) + 4 * (SD + C) + 4 * N * N  # weights + corr accumulator
        if io + tmp + fixed <= vmem_budget:
            best = bt
    return best


# ----------------------------------------------------------------------------
# Forward wrapper
# ----------------------------------------------------------------------------
def multi_manifold_forward(x, target, params, *, matmul_dtype=jnp.bfloat16,
                           max_block_batch=None):
    B, N, L, H = x.shape
    spaces = [p for p in params["spaces"] if L - p["tau"] * (p["E"] - 1) >= 0]
    assert spaces, "no valid manifold spaces for this sequence length"
    S = len(spaces)
    D = spaces[0]["conv_w"].shape[-1]
    C = params["w_out"].shape[-1]
    LH, SD = L * H, S * D

    weff, pb_all = _build_effective_weights(spaces, L, H)           # (L*H, S*D), (1, S*D)
    # mean over spaces folded into the output GEMM: concat(conv_x) @ vstack([w_out/S]*S)
    wout_big = jnp.concatenate([params["w_out"] / S] * S, axis=0)   # (S*D, C)
    bout = params["b_out"].astype(jnp.float32)                      # (1, C)

    # x stays f32 in HBM (bf16 cast happens inside the kernel); merging (L,H) is free.
    x_flat = x.reshape(B, N, LH).astype(jnp.float32)
    target = target.astype(jnp.float32)
    weff = weff.astype(matmul_dtype)
    wout_big = wout_big.astype(matmul_dtype)
    pb_all = pb_all.astype(jnp.float32)

    # ---- per-generation sizing: G TensorCores, Bt batches per step, VMEM limit
    ncores = _num_tensorcores()
    G = ncores if (B >= ncores and B % ncores == 0) else 1
    BperG = B // G
    vmem_cap = _vmem_capacity_bytes()
    Bt = _choose_bt(BperG, N, L, H, SD, C, int(vmem_cap * 0.6), max_block_batch)
    steps = BperG // Bt
    vmem_limit = int(min(max(32 << 20, (vmem_cap * 3) // 4), 100 << 20))

    kernel = functools.partial(_mme_fused_kernel, compute_dtype=matmul_dtype)

    flops = 2 * B * N * (LH * SD + SD * C + N * L + N * C)
    cost = pl.CostEstimate(
        flops=int(flops),
        transcendentals=int(B * N * (SD + C + 1)),
        bytes_accessed=int(4 * (B * N * (LH + L + C) + G * N * N)
                           + 2 * (LH * SD + SD * C) + 4 * (SD + C)))

    out, corr_parts = pl.pallas_call(
        kernel,
        out_shape=(jax.ShapeDtypeStruct((B, N, C), jnp.float32),
                   jax.ShapeDtypeStruct((G, N, N), jnp.float32)),
        grid=(G, steps),
        in_specs=[
            pl.BlockSpec((Bt, N, LH), lambda g, j: (g * steps + j, 0, 0)),
            pl.BlockSpec((LH, SD), lambda g, j: (0, 0)),
            pl.BlockSpec((1, SD), lambda g, j: (0, 0)),
            pl.BlockSpec((Bt, N, L), lambda g, j: (g * steps + j, 0, 0)),
            pl.BlockSpec((SD, C), lambda g, j: (0, 0)),
            pl.BlockSpec((1, C), lambda g, j: (0, 0)),
        ],
        out_specs=(
            pl.BlockSpec((Bt, N, C), lambda g, j: (g * steps + j, 0, 0)),
            pl.BlockSpec((1, N, N), lambda g, j: (g, 0, 0)),   # resident across inner axis
        ),
        compiler_params=pltpu.CompilerParams(
            dimension_semantics=("parallel", "arbitrary"),
            vmem_limit_bytes=vmem_limit),
        cost_estimate=cost,
    )(x_flat, weff, pb_all, target, wout_big, bout)

    # raw pearson sums per core -> batch mean (the 1/B scale is applied exactly once here)
    corrs = jnp.sum(corr_parts, axis=0) * (1.0 / B)
    return out, corrs


# ----------------------------------------------------------------------------
# Parameters (deterministic synthetic init; shapes follow the torch module)
# ----------------------------------------------------------------------------
def init_params(key, c_in, d_model, seq_len, taus):
    Es = get_manifold_e_by_tau(np.asarray(taus))
    spaces = []
    for tau, E in zip(taus, Es):
        tau, E = int(tau), int(E)
        n_me = seq_len - tau * (E - 1)  # n_manifold_embed
        key, k1, k2, k3 = jax.random.split(key, 4)
        # torch Conv1d weight (d_model, c_in, E), kaiming-ish scale; stored as (E, c_in, d_model)
        conv_w = jax.random.normal(k1, (E, c_in, d_model), jnp.float32) * float(np.sqrt(2.0 / (c_in * E)))
        # torch Linear(n_me, 1): weight (1, n_me), bias (1,)
        pw = jax.random.normal(k2, (1, n_me), jnp.float32) * float(1.0 / np.sqrt(n_me))
        pb = 0.01 * jax.random.normal(k3, (1, 1), jnp.float32)
        spaces.append(dict(tau=tau, E=E, conv_w=conv_w, pw=pw, pb=pb))
    key, kw, kb = jax.random.split(key, 3)
    # torch Linear(d_model, c_in): stored transposed as (d_model, c_in)
    w_out = jax.random.normal(kw, (d_model, c_in), jnp.float32) * float(1.0 / np.sqrt(d_model))
    b_out = 0.01 * jax.random.normal(kb, (1, c_in), jnp.float32)
    return dict(spaces=spaces, w_out=w_out, b_out=b_out)


if __name__ == "__main__":
    # Small shapes consistent with the module: c_in = H, seq_len = L.
    B, N, L, H = 4, 8, 80, 4
    c_in, d_model = H, 32
    taus = np.array([18, 24])   # -> Es = [5, 3]; L_out = [8, 32]; both valid for L=80

    key = jax.random.PRNGKey(0)
    kx, kt, kp = jax.random.split(key, 3)
    x = jax.random.normal(kx, (B, N, L, H), dtype=jnp.float32)
    target = jax.random.normal(kt, (B, N, L), dtype=jnp.float32)
    params = init_params(kp, c_in, d_model, L, taus)

    # Main run (auto-sized Bt batches per grid step).
    out, corrs = multi_manifold_forward(x, target, params)
    jax.block_until_ready((out, corrs))
    assert out.shape == (B, N, c_in), out.shape
    assert corrs.shape == (N, N), corrs.shape
    assert bool(jnp.all(jnp.isfinite(out))) and bool(jnp.all(jnp.isfinite(corrs)))

    # Cross-check the multi-step corr-accumulator path (Bt=1) against the batched path.
    out1, corrs1 = multi_manifold_forward(x, target, params, max_block_batch=1)
    jax.block_until_ready((out1, corrs1))
    assert bool(jnp.allclose(out, out1, rtol=2e-4, atol=2e-4))
    assert bool(jnp.allclose(corrs, corrs1, rtol=2e-4, atol=2e-4))

    print("KERNEL_OK")
</pallas_src>

<mosaic_0001>
module attributes {stable_mosaic.version = 11 : i64} {
  func.func @_mme_fused_kernel(%arg0: i32, %arg1: i32, %arg2: memref<4x8x320xf32, #tpu.memory_space<vmem>>, %arg3: memref<320x64xbf16, #tpu.memory_space<vmem>>, %arg4: memref<1x64xf32, #tpu.memory_space<vmem>>, %arg5: memref<4x8x80xf32, #tpu.memory_space<vmem>>, %arg6: memref<64x4xbf16, #tpu.memory_space<vmem>>, %arg7: memref<1x4xf32, #tpu.memory_space<vmem>>, %arg8: memref<4x8x4xf32, #tpu.memory_space<vmem>>, %arg9: memref<1x8x8xf32, #tpu.memory_space<vmem>>) attributes {dimension_semantics = [#tpu.dimension_semantics<parallel>, #tpu.dimension_semantics<arbitrary>], iteration_bounds = array<i64: 1, 1>, scalar_prefetch = 0 : i64, scratch_operands = 0 : i64, tpu.core_type = #tpu.core_type<tc>, window_params = [{transform_indices = @transform_0, window_bounds = array<i64: 4, 8, 320>}, {pipeline_mode = #tpu.pipeline_mode<synchronous>, transform_indices = @transform_1, window_bounds = array<i64: 320, 64>}, {pipeline_mode = #tpu.pipeline_mode<synchronous>, transform_indices = @transform_2, window_bounds = array<i64: 1, 64>}, {transform_indices = @transform_3, window_bounds = array<i64: 4, 8, 80>}, {pipeline_mode = #tpu.pipeline_mode<synchronous>, transform_indices = @transform_4, window_bounds = array<i64: 64, 4>}, {pipeline_mode = #tpu.pipeline_mode<synchronous>, transform_indices = @transform_5, window_bounds = array<i64: 1, 4>}, {transform_indices = @transform_6, window_bounds = array<i64: 4, 8, 4>}, {transform_indices = @transform_7, window_bounds = array<i64: 1, 8, 8>}]} {
    %c0 = arith.constant 0 : index
    %c0_0 = arith.constant 0 : index
    %c0_1 = arith.constant 0 : index
    %0 = vector.load %arg2[%c0, %c0_0, %c0_1] : memref<4x8x320xf32, #tpu.memory_space<vmem>>, vector<4x8x320xf32>
    %1 = vector.shape_cast %0 : vector<4x8x320xf32> to vector<32x320xf32>
    %2 = arith.truncf %1 : vector<32x320xf32> to vector<32x320xbf16>
    %c0_2 = arith.constant 0 : index
    %c0_3 = arith.constant 0 : index
    %3 = vector.load %arg3[%c0_2, %c0_3] : memref<320x64xbf16, #tpu.memory_space<vmem>>, vector<320x64xbf16>
    %cst = arith.constant dense<0.000000e+00> : vector<32x64xf32>
    %4 = tpu.matmul %2, %3, %cst {dimension_numbers = #tpu.dot_dimension_numbers<[1], [0], [0], [1], [0, 0, 1, 1], [], []>} : vector<32x320xbf16>, vector<320x64xbf16>, vector<32x64xf32> -> vector<32x64xf32>
    %c0_4 = arith.constant 0 : index
    %c0_5 = arith.constant 0 : index
    %5 = vector.load %arg4[%c0_4, %c0_5] : memref<1x64xf32, #tpu.memory_space<vmem>>, vector<1x64xf32>
    %6 = vector.broadcast %5 : vector<1x64xf32> to vector<32x64xf32>
    %7 = arith.addf %4, %6 : vector<32x64xf32>
    %cst_6 = arith.constant 5.000000e-01 : f32
    %8 = vector.broadcast %cst_6 : f32 to vector<32x64xf32>
    %9 = arith.mulf %8, %7 : vector<32x64xf32>
    %10 = arith.mulf %7, %7 : vector<32x64xf32>
    %11 = arith.mulf %10, %7 : vector<32x64xf32>
    %cst_7 = arith.constant 4.471500e-02 : f32
    %12 = vector.broadcast %cst_7 : f32 to vector<32x64xf32>
    %13 = arith.mulf %12, %11 : vector<32x64xf32>
    %14 = arith.addf %7, %13 : vector<32x64xf32>
    %cst_8 = arith.constant 0.797884583 : f32
    %15 = vector.broadcast %cst_8 : f32 to vector<32x64xf32>
    %16 = arith.mulf %15, %14 : vector<32x64xf32>
    %17 = math.tanh %16 : vector<32x64xf32>
    %cst_9 = arith.constant 1.000000e+00 : f32
    %18 = vector.broadcast %cst_9 : f32 to vector<32x64xf32>
    %19 = arith.addf %18, %17 : vector<32x64xf32>
    %20 = arith.mulf %9, %19 : vector<32x64xf32>
    %21 = arith.truncf %20 : vector<32x64xf32> to vector<32x64xbf16>
    %c0_10 = arith.constant 0 : index
    %c0_11 = arith.constant 0 : index
    %22 = vector.load %arg6[%c0_10, %c0_11] : memref<64x4xbf16, #tpu.memory_space<vmem>>, vector<64x4xbf16>
    %cst_12 = arith.constant dense<0.000000e+00> : vector<32x4xf32>
    %23 = tpu.matmul %21, %22, %cst_12 {dimension_numbers = #tpu.dot_dimension_numbers<[1], [0], [0], [1], [0, 0, 1, 1], [], []>} : vector<32x64xbf16>, vector<64x4xbf16>, vector<32x4xf32> -> vector<32x4xf32>
    %24 = vector.shape_cast %23 : vector<32x4xf32> to vector<4x8x4xf32>
    %c0_13 = arith.constant 0 : index
    %c0_14 = arith.constant 0 : index
    %c0_15 = arith.constant 0 : index
    %25 = vector.load %arg5[%c0_13, %c0_14, %c0_15] : memref<4x8x80xf32, #tpu.memory_space<vmem>>, vector<4x8x80xf32>
    %cst_16 = arith.constant dense<0.000000e+00> : vector<4x8xf32>
    %26 = vector.multi_reduction <add>, %25, %cst_16 [2] : vector<4x8x80xf32> to vector<4x8xf32>
    %27 = vector.shape_cast %26 : vector<4x8xf32> to vector<4x8x1xf32>
    %cst_17 = arith.constant 8.000000e+01 : f32
    %28 = vector.broadcast %cst_17 : f32 to vector<4x8x1xf32>
    %29 = arith.divf %27, %28 : vector<4x8x1xf32>
    %30 = vector.broadcast %29 : vector<4x8x1xf32> to vector<4x8x80xf32>
    %31 = arith.subf %25, %30 : vector<4x8x80xf32>
    %32 = arith.mulf %31, %31 : vector<4x8x80xf32>
    %cst_18 = arith.constant dense<0.000000e+00> : vector<4x8xf32>
    %33 = vector.multi_reduction <add>, %32, %cst_18 [2] : vector<4x8x80xf32> to vector<4x8xf32>
    %34 = vector.shape_cast %33 : vector<4x8xf32> to vector<4x8x1xf32>
    %cst_19 = arith.constant 9.99999997E-7 : f32
    %35 = vector.broadcast %cst_19 : f32 to vector<4x8x1xf32>
    %36 = arith.addf %34, %35 : vector<4x8x1xf32>
    %37 = math.rsqrt %36 : vector<4x8x1xf32>
    %38 = vector.broadcast %37 : vector<4x8x1xf32> to vector<4x8x80xf32>
    %39 = arith.mulf %31, %38 : vector<4x8x80xf32>
    "tpu.trace_start"() <{level = 10 : i32, message = "bnl,bml->bnm"}> : () -> ()
    %cst_20 = arith.constant dense<0.000000e+00> : vector<4x8x8xf32>
    %40 = tpu.matmul %39, %39, %cst_20 {dimension_numbers = #tpu.dot_dimension_numbers<[2], [2], [1], [1], [0, 0, 0, 1, 1, 1], [0], [0]>} : vector<4x8x80xf32>, vector<4x8x80xf32>, vector<4x8x8xf32> -> vector<4x8x8xf32>
    "tpu.trace_stop"() : () -> ()
    %cst_21 = arith.constant dense<0.000000e+00> : vector<8x8xf32>
    %41 = vector.multi_reduction <add>, %40, %cst_21 [0] : vector<4x8x8xf32> to vector<8x8xf32>
    %42 = vector.shape_cast %41 : vector<8x8xf32> to vector<1x8x8xf32>
    %c0_i32 = arith.constant 0 : i32
    %43 = arith.cmpi eq, %arg1, %c0_i32 : i32
    %44 = arith.extui %43 : i1 to i32
    %c0_i32_22 = arith.constant 0 : i32
    %45 = arith.cmpi ne, %44, %c0_i32_22 : i32
    scf.if %45 {
      %c0_35 = arith.constant 0 : index
      %c0_36 = arith.constant 0 : index
      %c0_37 = arith.constant 0 : index
      %68 = vector.load %arg9[%c0_35, %c0_36, %c0_37] : memref<1x8x8xf32, #tpu.memory_space<vmem>>, vector<1x8x8xf32>
      tpu.vector_store %arg9[%c0_35, %c0_36, %c0_37], %42 {strides = array<i32>} : memref<1x8x8xf32, #tpu.memory_space<vmem>>, vector<1x8x8xf32>,
    } else {
    }
    %c0_i32_23 = arith.constant 0 : i32
    %46 = arith.cmpi sgt, %arg1, %c0_i32_23 : i32
    %47 = arith.extui %46 : i1 to i32
    %c0_i32_24 = arith.constant 0 : i32
    %48 = arith.cmpi ne, %47, %c0_i32_24 : i32
    scf.if %48 {
      %c0_35 = arith.constant 0 : index
      %c0_36 = arith.constant 0 : index
      %c0_37 = arith.constant 0 : index
      %68 = vector.load %arg9[%c0_35, %c0_36, %c0_37] : memref<1x8x8xf32, #tpu.memory_space<vmem>>, vector<1x8x8xf32>
      %69 = arith.addf %68, %42 : vector<1x8x8xf32>
      %c0_38 = arith.constant 0 : index
      %c0_39 = arith.constant 0 : index
      %c0_40 = arith.constant 0 : index
      %70 = vector.load %arg9[%c0_38, %c0_39, %c0_40] : memref<1x8x8xf32, #tpu.memory_space<vmem>>, vector<1x8x8xf32>
      tpu.vector_store %arg9[%c0_38, %c0_39, %c0_40], %69 {strides = array<i32>} : memref<1x8x8xf32, #tpu.memory_space<vmem>>, vector<1x8x8xf32>,
    } else {
    }
    "tpu.trace_start"() <{level = 10 : i32, message = "bnm,bmc->bnc"}> : () -> ()
    %cst_25 = arith.constant dense<0.000000e+00> : vector<4x8x4xf32>
    %49 = tpu.matmul %40, %24, %cst_25 {dimension_numbers = #tpu.dot_dimension_numbers<[2], [1], [1], [2], [0, 0, 0, 1, 1, 2], [0], [0]>} : vector<4x8x8xf32>, vector<4x8x4xf32>, vector<4x8x4xf32> -> vector<4x8x4xf32>
    "tpu.trace_stop"() : () -> ()
    %c0_26 = arith.constant 0 : index
    %c0_27 = arith.constant 0 : index
    %50 = vector.load %arg7[%c0_26, %c0_27] : memref<1x4xf32, #tpu.memory_space<vmem>>, vector<1x4xf32>
    %51 = vector.shape_cast %50 : vector<1x4xf32> to vector<1x1x4xf32>
    %52 = vector.broadcast %51 : vector<1x1x4xf32> to vector<4x8x4xf32>
    %53 = arith.addf %49, %52 : vector<4x8x4xf32>
    %cst_28 = arith.constant 5.000000e-01 : f32
    %54 = vector.broadcast %cst_28 : f32 to vector<4x8x4xf32>
    %55 = arith.mulf %54, %53 : vector<4x8x4xf32>
    %56 = arith.mulf %53, %53 : vector<4x8x4xf32>
    %57 = arith.mulf %56, %53 : vector<4x8x4xf32>
    %cst_29 = arith.constant 4.471500e-02 : f32
    %58 = vector.broadcast %cst_29 : f32 to vector<4x8x4xf32>
    %59 = arith.mulf %58, %57 : vector<4x8x4xf32>
    %60 = arith.addf %53, %59 : vector<4x8x4xf32>
    %cst_30 = arith.constant 0.797884583 : f32
    %61 = vector.broadcast %cst_30 : f32 to vector<4x8x4xf32>
    %62 = arith.mulf %61, %60 : vector<4x8x4xf32>
    %63 = math.tanh %62 : vector<4x8x4xf32>
    %cst_31 = arith.constant 1.000000e+00 : f32
    %64 = vector.broadcast %cst_31 : f32 to vector<4x8x4xf32>
    %65 = arith.addf %64, %63 : vector<4x8x4xf32>
    %66 = arith.mulf %55, %65 : vector<4x8x4xf32>
    %c0_32 = arith.constant 0 : index
    %c0_33 = arith.constant 0 : index
    %c0_34 = arith.constant 0 : index
    %67 = vector.load %arg8[%c0_32, %c0_33, %c0_34] : memref<4x8x4xf32, #tpu.memory_space<vmem>>, vector<4x8x4xf32>
    tpu.vector_store %arg8[%c0_32, %c0_33, %c0_34], %66 {strides = array<i32>} : memref<4x8x4xf32, #tpu.memory_space<vmem>>, vector<4x8x4xf32>,
    return
  }
  func.func @transform_0(%arg0: i32, %arg1: i32) -> (i32, i32, i32) {
    %c1_i32 = arith.constant 1 : i32
    %0 = arith.muli %arg0, %c1_i32 : i32
    %1 = arith.addi %0, %arg1 : i32
    %c0_i32 = arith.constant 0 : i32
    %c0_i32_0 = arith.constant 0 : i32
    %c0_i32_1 = arith.constant 0 : i32
    return %1, %c0_i32, %c0_i32_0 : i32, i32, i32
  }
  func.func @transform_1(%arg0: i32, %arg1: i32) -> (i32, i32) {
    %c0_i32 = arith.constant 0 : i32
    %c0_i32_0 = arith.constant 0 : i32
    %c0_i32_1 = arith.constant 0 : i32
    return %c0_i32, %c0_i32_0 : i32, i32
  }
  func.func @transform_2(%arg0: i32, %arg1: i32) -> (i32, i32) {
    %c0_i32 = arith.constant 0 : i32
    %c0_i32_0 = arith.constant 0 : i32
    %c0_i32_1 = arith.constant 0 : i32
    return %c0_i32, %c0_i32_0 : i32, i32
  }
  func.func @transform_3(%arg0: i32, %arg1: i32) -> (i32, i32, i32) {
    %c1_i32 = arith.constant 1 : i32
    %0 = arith.muli %arg0, %c1_i32 : i32
    %1 = arith.addi %0, %arg1 : i32
    %c0_i32 = arith.constant 0 : i32
    %c0_i32_0 = arith.constant 0 : i32
    %c0_i32_1 = arith.constant 0 : i32
    return %1, %c0_i32, %c0_i32_0 : i32, i32, i32
  }
  func.func @transform_4(%arg0: i32, %arg1: i32) -> (i32, i32) {
    %c0_i32 = arith.constant 0 : i32
    %c0_i32_0 = arith.constant 0 : i32
    %c0_i32_1 = arith.constant 0 : i32
    return %c0_i32, %c0_i32_0 : i32, i32
  }
  func.func @transform_5(%arg0: i32, %arg1: i32) -> (i32, i32) {
    %c0_i32 = arith.constant 0 : i32
    %c0_i32_0 = arith.constant 0 : i32
    %c0_i32_1 = arith.constant 0 : i32
    return %c0_i32, %c0_i32_0 : i32, i32
  }
  func.func @transform_6(%arg0: i32, %arg1: i32) -> (i32, i32, i32) {
    %c1_i32 = arith.constant 1 : i32
    %0 = arith.muli %arg0, %c1_i32 : i32
    %1 = arith.addi %0, %arg1 : i32
    %c0_i32 = arith.constant 0 : i32
    %c0_i32_0 = arith.constant 0 : i32
    %c0_i32_1 = arith.constant 0 : i32
    return %1, %c0_i32, %c0_i32_0 : i32, i32, i32
  }
  func.func @transform_7(%arg0: i32, %arg1: i32) -> (i32, i32, i32) {
    %c0_i32 = arith.constant 0 : i32
    %c0_i32_0 = arith.constant 0 : i32
    %c0_i32_1 = arith.constant 0 : i32
    return %arg0, %c0_i32, %c0_i32_0 : i32, i32, i32
  }
}

</mosaic_0001>

<bundles_post_ra>
// kernel: tpu_custom_call.1
= control target key start
LH: loop header
LB: loop body
LE: loop exit
PB: predicated region body
PF: predicated region fallthrough
CT: control target
= control target key end

     0   :  { %13 = vsyncpa [#allocation3], 0  ;;  %s1951_s0 = inlined_call_operand.hbm [shape: f32[4,8,320], index: 0, kind: input, shape index: {}]   ;;  %s1952_s1 = inlined_call_operand.hbm [shape: bf16[320,64], index: 1, kind: input, shape index: {}]   ;;  %s1953_s2 = inlined_call_operand.hbm [shape: f32[1,64], index: 2, kind: input, shape index: {}]   ;;  %s1954_s3 = inlined_call_operand.hbm [shape: f32[4,8,80], index: 3, kind: input, shape index: {}]   ;;  %s1955_s4 = inlined_call_operand.hbm [shape: bf16[64,4], index: 4, kind: input, shape index: {}]   ;;  %s1956_s5 = inlined_call_operand.hbm [shape: f32[1,4], index: 5, kind: input, shape index: {}]   ;;  %s1957_s6 = inlined_call_operand.hbm [shape: f32[4,8,4], index: 6, kind: output, shape index: {0}]   ;;  %s1958_s7 = inlined_call_operand.hbm [shape: f32[1,8,8], index: 7, kind: output, shape index: {1}]  }
   0x1   :  { %14 = vsyncpa [#allocation6], 0 }
   0x2   :  { %15 = vsyncpa [#allocation9], 0 }
   0x3   :  { %16 = vsyncpa [#allocation12], 0 }
   0x4   :  { %17 = vsyncpa [#allocation4], 0 }
   0x5   :  { %18 = vsyncpa [#allocation15], 0  ;;  %s1694_s24 = smov [#allocation5]   ;;  %s1506_s28 = scalar_lea.hbm %s1952_s1, 2560 }
   0x6   :  { %s41_s25 = sshll.u32 %s1694_s24, 4  ;;  %p1507_p0 = scmp.ne.s32.totalorder %s1952_s1, %s1506_s28  ;;  %s42_s25 = int_to_ptr.vmem [resolvable:$true] %s41_s25 }
   0x7   :  { %p1510_p1 = scmp.lt.u32.totalorder %s1506_s28, %s1952_s1 }
   0x9   :  { %p1512_p2 = pnand %p1510_p1, %p1507_p0 }
   0xb   :  { %1515 = shalt.err (!%p1512_p2)
}
   0xc   :  { %s1516_s10 = scalar_lea.vmem %s42_s25, 2560  ;;  %p1521_p4 = scmp.lt.s32.totalorder %s42_s25, %s42_s25 }
   0xd   :  { %p1517_p3 = scmp.ne.s32.totalorder %s42_s25, %s1516_s10  ;;  %p1522_p5 = scmp.lt.s32.totalorder %s1516_s10, %s1516_s10 }
   0xf   :  { %p1523_p6 = por %p1522_p5, %p1521_p4 }
  0x11   :  { %p1524_p7 = pnand %p1523_p6, %p1517_p3 }
  0x13   :  { %1527 = shalt.err (!%p1524_p7)
}
  0x14   :  { %s1695_s11 = smov 64   ;;  %s1696_s12 = smov 4  }
  0x15   :  { %47 = dma.hbm_to_vmem [thread:$0]  %s1952_s1, 2560, %s42_s25, [#allocation6], %s1695_s11, %s1695_s11, %s1696_s12  }
  0x16   :  { %s1697_s15 = smov [#allocation8]   ;;  %s1528_s19 = scalar_lea.hbm %s1954_s3, 512 }
  0x17   :  { %s67_s16 = sshll.u32 %s1697_s15, 4  ;;  %p1529_p8 = scmp.ne.s32.totalorder %s1954_s3, %s1528_s19  ;;  %s68_s16 = int_to_ptr.vmem [resolvable:$true] %s67_s16 }
  0x18   :  { %p1532_p9 = scmp.lt.u32.totalorder %s1528_s19, %s1954_s3 }
  0x1a   :  { %p1534_p10 = pnand %p1532_p9, %p1529_p8 }
  0x1c   :  { %1537 = shalt.err (!%p1534_p10)
}
  0x1d   :  { %s1538_s24 = scalar_lea.vmem %s68_s16, 512  ;;  %p1543_p12 = scmp.lt.s32.totalorder %s68_s16, %s68_s16 }
  0x1e   :  { %p1539_p11 = scmp.ne.s32.totalorder %s68_s16, %s1538_s24  ;;  %p1544_p13 = scmp.lt.s32.totalorder %s1538_s24, %s1538_s24 }
  0x20   :  { %p1545_p0 = por %p1544_p13, %p1543_p12 }
  0x22   :  { %p1546_p1 = pnand %p1545_p0, %p1539_p11 }
  0x24   :  { %1549 = shalt.err (!%p1546_p1)
}
  0x25   :  { %s1698_s1 = smov 128   ;;  %s1699_s25 = smov 8  }
  0x26   :  { %73 = dma.hbm_to_vmem [thread:$0]  %s1954_s3, 512, %s68_s16, [#allocation9], %s1698_s1, %s1698_s1, %s1699_s25  }
  0x27   :  { %s1700_s28 = smov [#allocation2]   ;;  %s1550_s9 = scalar_lea.hbm %s1951_s0, 1536 }
  0x28   :  { %s29_s29 = sshll.u32 %s1700_s28, 4  ;;  %p1551_p2 = scmp.ne.s32.totalorder %s1951_s0, %s1550_s9  ;;  %s30_s29 = int_to_ptr.vmem [resolvable:$true] %s29_s29 }
  0x29   :  { %p1554_p3 = scmp.lt.u32.totalorder %s1550_s9, %s1951_s0 }
  0x2b   :  { %p1556_p4 = pnand %p1554_p3, %p1551_p2 }
  0x2d   :  { %1559 = shalt.err (!%p1556_p4)
}
  0x2e   :  { %s1560_s17 = scalar_lea.vmem %s30_s29, 1536  ;;  %p1565_p6 = scmp.lt.s32.totalorder %s30_s29, %s30_s29 }
  0x2f   :  { %p1561_p5 = scmp.ne.s32.totalorder %s30_s29, %s1560_s17  ;;  %p1566_p7 = scmp.lt.s32.totalorder %s1560_s17, %s1560_s17 }
  0x31   :  { %p1567_p8 = por %p1566_p7, %p1565_p6 }
  0x33   :  { %p1568_p9 = pnand %p1567_p8, %p1561_p5 }
  0x35   :  { %1571 = shalt.err (!%p1568_p9)
}
  0x36   :  { %s1701_s3 = smov 384   ;;  %s1702_s16 = smov 24  }
  0x37   :  { %35 = dma.hbm_to_vmem [thread:$0]  %s1951_s0, 1536, %s30_s29, [#allocation3], %s1701_s3, %s1701_s3, %s1702_s16  }
  0x38   :  { %s1703_s20 = smov [#allocation7]   ;;  %s1704_s22 = smov [#allocation10]  }
  0x39   :  { %s54_s21 = sshll.u32 %s1703_s20, 4  ;;  %s79_s23 = sshll.u32 %s1704_s22, 4  ;;  %s55_s21 = int_to_ptr.vmem [resolvable:$true] %s54_s21  ;;  %s80_s23 = int_to_ptr.vmem [resolvable:$true] %s79_s23 }
  0x3a   :  { %s1572_s27 = scalar_lea.hbm %s1953_s2, 16 }
  0x3b   :  { %p1573_p10 = scmp.ne.s32.totalorder %s1953_s2, %s1572_s27  ;;  %p1576_p11 = scmp.lt.u32.totalorder %s1572_s27, %s1953_s2 }
  0x3d   :  { %p1578_p12 = pnand %p1576_p11, %p1573_p10 }
  0x3f   :  { %1581 = shalt.err (!%p1578_p12)
}
  0x40   :  { %s1582_s0 = scalar_lea.vmem %s55_s21, 16  ;;  %s1586_s29 = scalar_lea.vmem %s55_s21, 32 }
  0x41   :  { %p1583_p13 = scmp.ne.s32.totalorder %s55_s21, %s1582_s0  ;;  %p1587_p0 = scmp.lt.s32.totalorder %s55_s21, %s55_s21 }
  0x42   :  { %p1588_p1 = scmp.lt.s32.totalorder %s1586_s29, %s1582_s0 }
  0x44   :  { %p1589_p2 = por %p1588_p1, %p1587_p0 }
  0x46   :  { %p1590_p3 = pnand %p1589_p2, %p1583_p13 }
  0x48   :  { %1593 = shalt.err (!%p1590_p3)
}
  0x49   :  { %57 = dma.hbm_to_vmem [thread:$0]  %s1953_s2, 16, %s55_s21, [#allocation6]  }
  0x4a   :  { %s1594_s17 = scalar_lea.hbm %s1955_s4, 512 }
  0x4b   :  { %p1595_p4 = scmp.ne.s32.totalorder %s1955_s4, %s1594_s17  ;;  %p1598_p5 = scmp.lt.u32.totalorder %s1594_s17, %s1955_s4 }
  0x4d   :  { %p1600_p6 = pnand %p1598_p5, %p1595_p4 }
  0x4f   :  { %1603 = shalt.err (!%p1600_p6)
}
  0x50   :  { %s1604_s20 = scalar_lea.vmem %s80_s23, 512  ;;  %p1609_p8 = scmp.lt.s32.totalorder %s80_s23, %s80_s23 }
  0x51   :  { %p1605_p7 = scmp.ne.s32.totalorder %s80_s23, %s1604_s20  ;;  %p1610_p9 = scmp.lt.s32.totalorder %s1604_s20, %s1604_s20 }
  0x53   :  { %p1611_p10 = por %p1610_p9, %p1609_p8 }
  0x55   :  { %p1612_p11 = pnand %p1611_p10, %p1605_p7 }
  0x57   :  { %1615 = shalt.err (!%p1612_p11)
}
  0x58   :  { %85 = dma.hbm_to_vmem [thread:$0]  %s1955_s4, 512, %s80_s23, [#allocation9], %s1695_s11, %s1695_s11, %s1696_s12  }
  0x59   :  { %s1705_s22 = smov [#allocation11]   ;;  %s1616_s28 = scalar_lea.hbm %s1956_s5, 16 }
  0x5a   :  { %s92_s24 = sshll.u32 %s1705_s22, 4  ;;  %p1617_p12 = scmp.ne.s32.totalorder %s1956_s5, %s1616_s28  ;;  %s93_s24 = int_to_ptr.vmem [resolvable:$true] %s92_s24 }
  0x5b   :  { %p1620_p13 = scmp.lt.u32.totalorder %s1616_s28, %s1956_s5 }
  0x5d   :  { %p1622_p0 = pnand %p1620_p13, %p1617_p12 }
  0x5f   :  { %1625 = shalt.err (!%p1622_p0)
}
  0x60   :  { %s1626_s29 = scalar_lea.vmem %s93_s24, 16  ;;  %s1630_s4 = scalar_lea.vmem %s93_s24, 32 }
  0x61   :  { %p1627_p1 = scmp.ne.s32.totalorder %s93_s24, %s1626_s29  ;;  %p1631_p2 = scmp.lt.s32.totalorder %s93_s24, %s93_s24 }
  0x62   :  { %p1632_p3 = scmp.lt.s32.totalorder %s1630_s4, %s1626_s29 }
  0x64   :  { %p1633_p4 = por %p1632_p3, %p1631_p2 }
  0x66   :  { %p1634_p5 = pnand %p1633_p4, %p1627_p1 }
  0x68   :  { %1637 = shalt.err (!%p1634_p5)
}
  0x69   :  { %95 = dma.hbm_to_vmem [thread:$0]  %s1956_s5, 16, %s93_s24, [#allocation12]  }
  0x6a   :  { %1682 = dma.done.wait [#allocation3], 1536  }
  0x6b   :  { %1683 = vsyncadd [#allocation3], 4294965760 }
  0x6c   :  { %1684 = dma.done.wait [#allocation6], 2576  }
  0x6d   :  { %1685 = vsyncadd [#allocation6], 4294964720 }
  0x6e   :  { %1686 = dma.done.wait [#allocation9], 1024  }
  0x6f   :  { %1687 = vsyncadd [#allocation9], 4294966272 }
  0x70   :  { %1688 = dma.done.wait [#allocation12], 16  }
  0x71   :  { %1689 = vsyncadd [#allocation12], 4294967280  ;;  %vm540_vm0 = vcmask 654336   ;;  %v1831_v0 = vld [vmem:[#allocation8] sm:$0xff]  ;;  %v1835_v4 = vld [vmem:[#allocation8 + $0x10] sm:$0xff]  ;;  %vm306_vm1 = vcmask 523264  }
  0x72   :  { %v541_v1 = vsel %vm540_vm0, %v1831_v0, 0.0  ;;  %v1458_v2 = vld [vmem:[#allocation5 + $0x40] sm:$0xff]   ;;  %v1837_v5 = vld [vmem:[#allocation8 + $0x8] sm:$0xff]  ;;  %v547_v6 = vsel %vm540_vm0, %v1835_v4, 0.0  ;;  %v1464_v14 = vld [vmem:[#allocation5 + $0x58] sm:$0xff]   ;;  %vm1707_vm2 = vmmov 0  }
  0x73   :  { %542 = vadd.xlane.f32.xlu0 %v541_v1  ;;  %v1459_v3 = vld [vmem:[#allocation5] sm:$0xff]   ;;  %1322 = vmatprep.subr.bf16.mxu0 %v1458_v2  ;;  %v544_v7 = vsel %vm540_vm0, %v1837_v5, 0.0  ;;  %v1460_v8 = vld [vmem:[#allocation5 + $0x48] sm:$0xff]   ;;  %v1462_v12 = vld [vmem:[#allocation5 + $0x50] sm:$0xff]   ;;  %vm882_vm3 = vcmask 64512   ;;  %s1708_s5 = smov [#allocation14]  }
  0x74   :  { %1323 = vmatpush3.bf16.msra.mxu0 %v1459_v3  ;;  %548 = vadd.xlane.f32.xlu1 %v547_v6  ;;  %v1461_v9 = vld [vmem:[#allocation5 + $0x8] sm:$0xff]   ;;  %v1843_v10 = vld [vmem:[#allocation8 + $0x18] sm:$0xff]  ;;  %v1463_v13 = vld [vmem:[#allocation5 + $0x10] sm:$0xff]   ;;  %v1706_v6 = vmov 0.0   ;;  %s1264_s23 = sshll.u32 %s1708_s5, 4  ;;  %s1265_s23 = int_to_ptr.vmem [resolvable:$true] %s1264_s23 }
  0x75   :  { %1324 = vmatprep.subr.bf16.mxu0 %v1460_v8  ;;  %v550_v11 = vsel %vm540_vm0, %v1843_v10, 0.0  ;;  %v1465_v15 = vld [vmem:[#allocation5 + $0x18] sm:$0xff]   ;;  %v1466_v16 = vld [vmem:[#allocation5 + $0x60] sm:$0xff]   ;;  %v1472_v19 = vld [vmem:[#allocation5 + $0x88] sm:$0xff]   ;;  %s1638_s10 = scalar_lea.vmem %s1265_s23, 128  ;;  %p1643_p7 = scmp.lt.s32.totalorder %s1265_s23, %s1265_s23 }
  0x76   :  { %v1469_v17 = vld [vmem:[#allocation5 + $0x80] sm:$0xff]   ;;  %v1468_v20 = vld [vmem:[#allocation5 + $0x68] sm:$0xff]   ;;  %v1475_v21 = vld [vmem:[#allocation5 + $0x90] sm:$0xff]   ;;  %p1639_p6 = scmp.ne.s32.totalorder %s1265_s23, %s1638_s10  ;;  %p1644_p8 = scmp.lt.s32.totalorder %s1638_s10, %s1638_s10 }
  0x77   :  { %545 = vadd.xlane.f32.xlu0 %v544_v7  ;;  %v1467_v18 = vld [vmem:[#allocation5 + $0x20] sm:$0xff]   ;;  %1378 = vmatprep.subr.bf16.mxu1 %v1469_v17  ;;  %v1470_v22 = vld [vmem:[#allocation5 + $0x28] sm:$0xff]   ;;  %v1471_v24 = vld [vmem:[#allocation5 + $0x70] sm:$0xff]  }
  0x78   :  { %1325 = vmatpush3.bf16.msra.mxu0 %v1461_v9  ;;  %551 = vadd.xlane.f32.xlu1 %v550_v11  ;;  %v122_v23 = vld [vmem:[#allocation2 + $0x8] sm:$0xff]  ;;  %v125_v25 = vld [vmem:[#allocation2 + $0x20] sm:$0xff]  ;;  %v1477_v27 = vld [vmem:[#allocation5 + $0x98] sm:$0xff]   ;;  %p1645_p9 = por %p1644_p8, %p1643_p7 }
  0x79   :  { %1326 = vmatprep.subr.bf16.mxu0 %v1462_v12  ;;  %1379 = vmatpush3.bf16.msra.mxu1 %v1469_v17  ;;  %v134_v26 = vpack.c.bf16 %v125_v25, %v122_v23  ;;  %v123_v28 = vld [vmem:[#allocation2 + $0x10] sm:$0xff]  ;;  %v126_v29 = vld [vmem:[#allocation2 + $0x28] sm:$0xff]  ;;  %v129_v32 = vld [vmem:[#allocation2 + $0x40] sm:$0xff] }
  0x7a   :  { %1380 = vmatprep.subr.bf16.mxu1 %v1472_v19  ;;  %v1473_v30 = vld [vmem:[#allocation5 + $0x30] sm:$0xff]   ;;  %v135_v31 = vpack.c.bf16 %v126_v29, %v123_v28  ;;  %v132_v33 = vld [vmem:[#allocation2 + $0x58] sm:$0xff]  ;;  %v121_v37 = vld [vmem:[#allocation2] sm:$0xff]  ;;  %p1646_p10 = pnand %p1645_p9, %p1639_p6 }
  0x7b   :  { %v1474_v34 = vld [vmem:[#allocation5 + $0x78] sm:$0xff]   ;;  %345 = vmatprep.mubr.bf16.mxu0 %v134_v26  ;;  %v138_v36 = vpack.c.bf16 %v132_v33, %v129_v32  ;;  %v131_v40 = vld [vmem:[#allocation2 + $0x50] sm:$0xff]  ;;  %v130_v44 = vld [vmem:[#allocation2 + $0x48] sm:$0xff] }
  0x7c   :  { %1327 = vmatpush3.bf16.msra.mxu0 %v1463_v13  ;;  %v1476_v35 = vld [vmem:[#allocation5 + $0x38] sm:$0xff]   ;;  %1386 = vmatprep.mubr.msk.bf16.mxu1 %vm306_vm1, %v135_v31  ;;  %v127_v43 = vld [vmem:[#allocation2 + $0x30] sm:$0xff]  ;;  %v1478_v51 = vld [vmem:[#allocation10] sm:$0xff]  }
  0x7d   :  { %1328 = vmatprep.subr.bf16.mxu0 %v1464_v14  ;;  %1381 = vmatpush3.bf16.msra.mxu1 %v1472_v19  ;;  %v124_v38 = vld [vmem:[#allocation2 + $0x18] sm:$0xff]  ;;  %v136_v45 = vpack.c.bf16 %v130_v44, %v127_v43  ;;  %v1479_v53 = vld [vmem:[#allocation10 + $0x8] sm:$0xff]   ;;  %v1280_v13 = vld [vmem:[#allocation7] ss:$0 sm:$0xff] }
  0x7e   :  { %1382 = vmatprep.subr.bf16.mxu1 %v1475_v21  ;;  %v128_v39 = vld [vmem:[#allocation2 + $0x38] sm:$0xff]  ;;  %v133_v41 = vpack.c.bf16 %v124_v38, %v121_v37 }
  0x7f   :  { %v137_v42 = vpack.c.bf16 %v131_v40, %v128_v39  ;;  %v1480_v62 = vld [vmem:[#allocation10 + $0x10] sm:$0xff]  }
  0x80   :  { %1329 = vmatpush3.bf16.msra.mxu0 %v1465_v15 }
  0x81   :  { %1330 = vmatprep.subr.bf16.mxu0 %v1466_v16  ;;  %1383 = vmatpush3.bf16.msra.mxu1 %v1475_v21 }
  0x82   :  { %1384 = vmatprep.subr.bf16.mxu1 %v1477_v27 }
  0x84   :  { %1331 = vmatpush3.bf16.msra.mxu0 %v1467_v18 }
  0x85   :  { %1332 = vmatprep.subr.bf16.mxu0 %v1468_v20  ;;  %1385 = vmatpush3.bf16.msra.mxu1 %v1477_v27 }
  0x86   :  { %1390 = vmatprep.subr.bf16.mxu1 %v1478_v51 }
  0x88   :  { %1333 = vmatpush3.bf16.msra.mxu0 %v1470_v22  ;;  %1387 = vmatmul.mubr.msk.bf16.vlgmr.msra.gmra.mrb[0].mxu1 %vm306_vm1, %v138_v36 }
  0x89   :  { %1334 = vmatprep.subr.bf16.mxu0 %v1471_v24  ;;  %1391 = vmatpush3.bf16.msra.mxu1 %v1478_v51 }
  0x8a   :  { %1392 = vmatprep.subr.bf16.mxu1 %v1479_v53 }
  0x8c   :  { %1335 = vmatpush3.bf16.msra.mxu0 %v1473_v30 }
  0x8d   :  { %1336 = vmatprep.subr.bf16.mxu0 %v1474_v34  ;;  %1393 = vmatpush3.bf16.msra.mxu1 %v1479_v53 }
  0x8e   :  { %1394 = vmatprep.subr.bf16.mxu1 %v1480_v62 }
  0x90   :  { %1337 = vmatpush3.bf16.msra.mxu0 %v1476_v35 }
  0x91   :  { %1395 = vmatpush3.bf16.msra.mxu1 %v1480_v62  ;;  %1412 = vmatprep.subr.mxu0 %v1706_v6 }
  0x93   :  { %346 = vmatmul.mubr.bf16.vlgmr.msra.gmra.mrb[0].mxu0 %v133_v41 }
  0x94   :  { %353 = vmatprep.mubr.bf16.mxu0 %v137_v42 }
  0x9b   :  { %354 = vmatmul.mubr.bf16.gmra.mrb[4].mxu0 %v136_v45 }
  0x9c   :  { %1414 = vmatprep.mubr.msk.f32.mxu0 %vm1707_vm2, %v1706_v6 }
 0x100   :  { %v543_v46 = vpop.xlane.xlu0 %542 }
 0x101   :  { %v554_v47 = vmul.f32 0.0125, %v543_v46  ;;  %v549_v48 = vpop.xlane.xlu1 %548 }
 0x102   :  { %v556_v50 = vmul.f32 0.0125, %v549_v48 }
 0x103   :  { %v1850_v49 = vsub.f32 %v1831_v0, %v554_v47 }
 0x104   :  { %v546_v52 = vpop.xlane.xlu0 %545  ;;  %v1853_v54 = vsub.f32 %v1835_v4, %v556_v50  ;;  %v1481_v4 = vld [vmem:[#allocation10 + $0x18] sm:$0xff]  }
 0x105   :  { %v555_v55 = vmul.f32 0.0125, %v546_v52  ;;  %v562_v56 = vmul.f32 %v1850_v49, %v1850_v49  ;;  %v552_v57 = vpop.xlane.xlu1 %551  ;;  %1396 = vmatprep.subr.bf16.mxu1 %v1481_v4 }
 0x106   :  { %v557_v59 = vmul.f32 0.0125, %v552_v57  ;;  %v564_v61 = vmul.f32 %v1853_v54, %v1853_v54  ;;  %1397 = vmatpush3.bf16.msra.mxu1 %v1481_v4 }
 0x107   :  { %v1858_v58 = vsub.f32 %v1837_v5, %v555_v55  ;;  %v566_v60 = vsel %vm540_vm0, %v562_v56, 0.0  ;;  %1402 = vmatprep.subr.mxu1 %v1706_v6 }
 0x108   :  { %567 = vadd.xlane.f32.xlu0 %v566_v60  ;;  %v1864_v63 = vsub.f32 %v1843_v10, %v557_v59  ;;  %v572_v0 = vsel %vm540_vm0, %v564_v61, 0.0 }
 0x109   :  { %v563_v1 = vmul.f32 %v1858_v58, %v1858_v58 }
 0x10a   :  { %v565_v3 = vmul.f32 %v1864_v63, %v1864_v63 }
 0x10b   :  { %v569_v2 = vsel %vm540_vm0, %v563_v1, 0.0 }
 0x10c   :  { %573 = vadd.xlane.f32.xlu0 %v572_v0  ;;  %570 = vadd.xlane.f32.xlu1 %v569_v2  ;;  %v575_v5 = vsel %vm540_vm0, %v565_v3, 0.0 }
 0x110   :  { %576 = vadd.xlane.f32.xlu1 %v575_v5 }
 0x15b   :  { %v1388_v7 = vpop.f32.mrb[0].mxu1 }
 0x15c   :  { %v396_v8 = vpop.f32.mrb[1].mxu1 }
 0x15d   :  { %v1389_v9 = vpop.f32.mrb[2].mxu1 }
 0x15e   :  { %v399_v10 = vpop.f32.mrb[3].mxu1 }
 0x166   :  { %v1338_v11 = vpop.f32.mrb[0].mxu0 }
 0x167   :  { %v1339_v12 = vpop.f32.mrb[1].mxu0 }
 0x168   :  { %v1340_v14 = vadd.f32 %v1339_v12, %v1338_v11  ;;  %v1341_v15 = vpop.f32.mrb[2].mxu0 }
 0x169   :  { %v1342_v16 = vpop.f32.mrb[3].mxu0 }
 0x16a   :  { %v1343_v17 = vadd.f32 %v1342_v16, %v1341_v15  ;;  %v348_v18 = vadd.f32 %v1340_v14, %v1280_v13 }
 0x16c   :  { %v397_v19 = vadd.f32 %v396_v8, %v348_v18  ;;  %v351_v20 = vadd.f32 %v1343_v17, %v1280_v13 }
 0x16e   :  { %v415_v21 = vmul.f32 %v397_v19, %v397_v19  ;;  %v400_v22 = vadd.f32 %v399_v10, %v351_v20  ;;  %v1344_v23 = vpop.f32.mrb[4].mxu0  ;;  %v411_v57 = vmul.f32 0.5, %v397_v19 }
 0x16f   :  { %v1345_v24 = vpop.f32.mrb[5].mxu0 }
 0x170   :  { %v419_v25 = vmul.f32 %v415_v21, %v397_v19  ;;  %v416_v26 = vmul.f32 %v400_v22, %v400_v22  ;;  %v1346_v27 = vadd.f32 %v1345_v24, %v1344_v23  ;;  %v1347_v28 = vpop.f32.mrb[6].mxu0  ;;  %v412_v59 = vmul.f32 0.5, %v400_v22 }
 0x171   :  { %v1348_v29 = vpop.f32.mrb[7].mxu0 }
 0x172   :  { %v423_v30 = vmul.f32 0.044715, %v419_v25  ;;  %v420_v31 = vmul.f32 %v416_v26, %v400_v22  ;;  %v356_v32 = vadd.f32 %v1346_v27, %v1280_v13  ;;  %v1349_v33 = vadd.f32 %v1348_v29, %v1347_v28 }
 0x174   :  { %v427_v34 = vadd.f32 %v423_v30, %v397_v19  ;;  %v424_v35 = vmul.f32 0.044715, %v420_v31  ;;  %v405_v36 = vadd.f32 %v1388_v7, %v356_v32  ;;  %v359_v37 = vadd.f32 %v1349_v33, %v1280_v13 }
 0x176   :  { %v431_v38 = vmul.f32 0.7978846, %v427_v34  ;;  %v428_v39 = vadd.f32 %v424_v35, %v400_v22  ;;  %v417_v40 = vmul.f32 %v405_v36, %v405_v36  ;;  %v408_v41 = vadd.f32 %v1389_v9, %v359_v37 }
 0x177   :  { %v413_v4 = vmul.f32 0.5, %v405_v36 }
 0x178   :  { %1482 = vtanh.f32 %v431_v38  ;;  %v432_v42 = vmul.f32 0.7978846, %v428_v39  ;;  %v421_v43 = vmul.f32 %v417_v40, %v405_v36  ;;  %v418_v44 = vmul.f32 %v408_v41, %v408_v41 }
 0x179   :  { %v414_v5 = vmul.f32 0.5, %v408_v41 }
 0x17a   :  { %1484 = vtanh.f32 %v432_v42  ;;  %v425_v45 = vmul.f32 0.044715, %v421_v43  ;;  %v422_v46 = vmul.f32 %v418_v44, %v408_v41 }
 0x17c   :  { %v429_v47 = vadd.f32 %v425_v45, %v405_v36  ;;  %v426_v48 = vmul.f32 0.044715, %v422_v46 }
 0x17e   :  { %v433_v50 = vmul.f32 0.7978846, %v429_v47  ;;  %v430_v51 = vadd.f32 %v426_v48, %v408_v41 }
 0x180   :  { %1486 = vtanh.f32 %v433_v50  ;;  %v434_v52 = vmul.f32 0.7978846, %v430_v51 }
 0x182   :  { %v1483_v53 = vpop.eup %1482  ;;  %1488 = vtanh.f32 %v434_v52 }
 0x183   :  { %v439_v55 = vadd.f32 1.0, %v1483_v53 }
 0x184   :  { %v1485_v56 = vpop.eup %1484 }
 0x185   :  { %v440_v60 = vadd.f32 1.0, %v1485_v56  ;;  %v443_v61 = vmul.f32 %v439_v55, %v411_v57 }
 0x187   :  { %v444_v62 = vmul.f32 %v440_v60, %v412_v59 }
 0x189   :  { %v447_v0 = vpack.c.bf16 %v444_v62, %v443_v61 }
 0x18a   :  { %v1487_v1 = vpop.eup %1486 }
 0x18b   :  { %1398 = vmatprep.mubr.msk.bf16.mxu1 %vm306_vm1, %v447_v0  ;;  %v441_v2 = vadd.f32 1.0, %v1487_v1 }
 0x18c   :  { %v1489_v3 = vpop.eup %1488 }
 0x18d   :  { %v442_v7 = vadd.f32 1.0, %v1489_v3  ;;  %v445_v8 = vmul.f32 %v441_v2, %v413_v4 }
 0x18f   :  { %v446_v9 = vmul.f32 %v442_v7, %v414_v5 }
 0x191   :  { %v448_v10 = vpack.c.bf16 %v446_v9, %v445_v8 }
 0x193   :  { %1399 = vmatmul.mubr.msk.bf16.vlgmr.msra.gmra.mrb[4].mxu1 %vm306_vm1, %v448_v10 }
 0x194   :  { %1404 = vmatprep.mubr.msk.f32.mxu1 %vm1707_vm2, %v1706_v6 }
 0x195   :  { %v568_v11 = vpop.xlane.xlu0 %567 }
 0x196   :  { %v578_v12 = vadd.f32 1e-06, %v568_v11 }
 0x198   :  { %1490 = vrsqrt.f32 %v578_v12 }
 0x199   :  { %v571_v13 = vpop.xlane.xlu1 %570  ;;  %v574_v14 = vpop.xlane.xlu0 %573 }
 0x19a   :  { %v579_v15 = vadd.f32 1e-06, %v571_v13  ;;  %v580_v16 = vadd.f32 1e-06, %v574_v14 }
 0x19c   :  { %1492 = vrsqrt.f32 %v579_v15 }
 0x19d   :  { %1494 = vrsqrt.f32 %v580_v16  ;;  %v577_v17 = vpop.xlane.xlu1 %576 }
 0x19e   :  { %v581_v18 = vadd.f32 1e-06, %v577_v17 }
 0x1a0   :  { %1496 = vrsqrt.f32 %v581_v18 }
 0x1a2   :  { %v1491_v19 = vpop.eup %1490 }
 0x1a3   :  { %v586_v20 = vmul.f32 %v1491_v19, %v1850_v49 }
 0x1a5   :  { %1403 = vmatpush3.xpose.msk.msra.mxu1 %vm540_vm0, %v586_v20 }
 0x1a6   :  { %v1493_v21 = vpop.eup %1492  ;;  %1407 = vmatprep.subr.mxu1 %v1706_v6 }
 0x1a7   :  { %v1495_v22 = vpop.eup %1494  ;;  %v587_v23 = vmul.f32 %v1493_v21, %v1858_v58 }
 0x1a8   :  { %v588_v24 = vmul.f32 %v1495_v22, %v1853_v54  ;;  %1405 = vmatmul.mubr.msk.f32.vlgmr.msra.gmra.mrb[8].mxu1 %vm540_vm0, %v586_v20 }
 0x1a9   :  { %1408 = vmatpush3.xpose.msk.msra.mxu1 %vm540_vm0, %v587_v23  ;;  %1409 = vmatprep.mubr.msk.f32.mxu1 %vm1707_vm2, %v1706_v6 }
 0x1aa   :  { %v1497_v25 = vpop.eup %1496  ;;  %1413 = vmatpush3.xpose.msk.msra.mxu0 %vm540_vm0, %v588_v24  ;;  %1417 = vmatprep.subr.mxu1 %v1706_v6 }
 0x1ab   :  { %v589_v49 = vmul.f32 %v1497_v25, %v1864_v63  ;;  %1422 = vmatprep.subr.mxu0 %v1706_v6 }
 0x1ac   :  { %1410 = vmatmul.mubr.msk.f32.vlgmr.msra.gmra.mrb[10].mxu1 %vm540_vm0, %v587_v23 }
 0x1ad   :  { %1415 = vmatmul.mubr.msk.f32.vlgmr.msra.gmra.mrb[8].mxu0 %vm540_vm0, %v588_v24  ;;  %1418 = vmatpush3.xpose.msk.msra.mxu1 %vm540_vm0, %v589_v49 }
 0x1ae   :  { %1419 = vmatprep.mubr.msk.f32.mxu1 %vm1707_vm2, %v1706_v6  ;;  %1427 = vmatprep.subr.mxu1 %v1706_v6 }
 0x1af   :  { %1424 = vmatprep.mubr.msk.f32.mxu0 %vm1707_vm2, %v1706_v6 }
 0x1b0   :  { %1420 = vmatmul.mubr.msk.f32.vlgmr.msra.gmra.mrb[12].mxu1 %vm540_vm0, %v589_v49 }
 0x1b1   :  { %1429 = vmatprep.mubr.msk.f32.mxu1 %vm1707_vm2, %v1706_v6 }
 0x266   :  { %v1400_v54 = vpop.f32.mrb[4].mxu1 }
 0x267   :  { %v521_v58 = vpop.f32.mrb[5].mxu1 }
 0x268   :  { %v1401_v63 = vpop.f32.mrb[6].mxu1  ;;  %1423 = vmatpush3.msra.mxu0 %v521_v58 }
 0x269   :  { %v524_v26 = vpop.f32.mrb[7].mxu1  ;;  %1432 = vmatprep.subr.mxu0 %v1706_v6 }
 0x26a   :  { %1428 = vmatpush3.msra.mxu1 %v524_v26 }
 0x26b   :  { %1437 = vmatprep.subr.mxu1 %v1706_v6 }
 0x27b   :  { %v659_v27 = vpop.f32.mrb[8].mxu1 }
 0x27c   :  { %v1406_v28 = vpop.f32.mrb[9].mxu1  ;;  %1425 = vmatmul.mubr.msk.f32.vlgmr.msra.gmra.mrb[10].mxu0 %vm882_vm3, %v659_v27  ;;  %v883_v30 = vsel %vm882_vm3, %v659_v27, 0.0 }
 0x27d   :  { %1433 = vmatpush3.msra.mxu0 %v1400_v54  ;;  %1434 = vmatprep.mubr.msk.f32.mxu0 %vm1707_vm2, %v1706_v6 }
 0x27f   :  { %v732_v29 = vpop.f32.mrb[10].mxu1 }
 0x280   :  { %v884_v31 = vsel %vm882_vm3, %v732_v29, 0.0  ;;  %v805_v32 = vpop.f32.mrb[8].mxu0  ;;  %v1411_v33 = vpop.f32.mrb[11].mxu1  ;;  %1430 = vmatmul.mubr.msk.f32.vlgmr.msra.gmra.mrb[14].mxu1 %vm882_vm3, %v732_v29 }
 0x281   :  { %v885_v34 = vadd.f32 %v884_v31, %v883_v30  ;;  %v1416_v35 = vpop.f32.mrb[9].mxu0  ;;  %1435 = vmatmul.mubr.msk.f32.vlgmr.msra.gmra.mrb[12].mxu0 %vm882_vm3, %v805_v32  ;;  %1438 = vmatpush3.msra.mxu1 %v1401_v63  ;;  %v886_v36 = vsel %vm882_vm3, %v805_v32, 0.0 }
 0x282   :  { %1439 = vmatprep.mubr.msk.f32.mxu1 %vm1707_vm2, %v1706_v6 }
 0x283   :  { %v887_v37 = vadd.f32 %v886_v36, %v885_v34  ;;  %v878_v38 = vpop.f32.mrb[12].mxu1 }
 0x284   :  { %v888_v39 = vsel %vm882_vm3, %v878_v38, 0.0  ;;  %v1421_v40 = vpop.f32.mrb[13].mxu1  ;;  %1440 = vmatmul.mubr.msk.f32.vlgmr.msra.gmra.mrb[16].mxu1 %vm882_vm3, %v878_v38 }
 0x285   :  { %v889_v41 = vadd.f32 %v888_v39, %v887_v37 }
 0x287   :  { %894 = vst.msk [vmem:[#allocation14] sm:$0xff] %vm882_vm3, %v889_v41 }
 0x288   :  { %1649 = shalt.err (!%p1646_p10)
}
 0x289   :  { %s1650_s15 = scalar_lea.hbm %s1958_s7, 128 }
 0x28a   :  { %p1651_p11 = scmp.ne.s32.totalorder %s1958_s7, %s1650_s15  ;;  %p1654_p12 = scmp.lt.u32.totalorder %s1650_s15, %s1958_s7 }
 0x28c   :  { %p1656_p13 = pnand %p1654_p12, %p1651_p11 }
 0x28e   :  { %1659 = shalt.err (!%p1656_p13)
}
 0x28f   :  { %1267 = dma.vmem_to_hbm [thread:$0]  %s1265_s23, 128, %s1958_s7, [#allocation15]   ;;  %v1317_v6 = vld [vmem:[#allocation11] ss:$0 sm:$0xff]  ;;  %vm1237_vm4 = vcmask 31744  }
 0x290   :  { %s1709_s7 = smov [#allocation13]  }
 0x291   :  { %s1251_s2 = sshll.u32 %s1709_s7, 4  ;;  %s1252_s2 = int_to_ptr.vmem [resolvable:$true] %s1251_s2 }
 0x292   :  { %s1660_s21 = scalar_lea.vmem %s1252_s2, 512  ;;  %p1665_p1 = scmp.lt.s32.totalorder %s1252_s2, %s1252_s2 }
 0x293   :  { %p1661_p0 = scmp.ne.s32.totalorder %s1252_s2, %s1660_s21  ;;  %p1666_p2 = scmp.lt.s32.totalorder %s1660_s21, %s1660_s21 }
 0x295   :  { %p1667_p3 = por %p1666_p2, %p1665_p1 }
 0x297   :  { %p1668_p4 = pnand %p1667_p3, %p1661_p0 }
 0x34f   :  { %v978_v42 = vpop.f32.mrb[10].mxu0 }
 0x350   :  { %v979_v43 = vadd.f32 %v1317_v6, %v978_v42  ;;  %v1426_v44 = vpop.f32.mrb[11].mxu0 }
 0x352   :  { %v1205_v45 = vmul.f32 %v979_v43, %v979_v43  ;;  %v1201_v16 = vmul.f32 0.5, %v979_v43 }
 0x353   :  { %v1051_v46 = vpop.f32.mrb[14].mxu1 }
 0x354   :  { %v1209_v47 = vmul.f32 %v1205_v45, %v979_v43  ;;  %v1052_v48 = vadd.f32 %v1317_v6, %v1051_v46  ;;  %v1124_v50 = vpop.f32.mrb[12].mxu0  ;;  %v1431_v51 = vpop.f32.mrb[15].mxu1 }
 0x355   :  { %v1125_v52 = vadd.f32 %v1317_v6, %v1124_v50  ;;  %v1436_v53 = vpop.f32.mrb[13].mxu0 }
 0x356   :  { %v1213_v55 = vmul.f32 0.044715, %v1209_v47  ;;  %v1206_v56 = vmul.f32 %v1052_v48, %v1052_v48  ;;  %v1202_v21 = vmul.f32 0.5, %v1052_v48 }
 0x357   :  { %v1207_v57 = vmul.f32 %v1125_v52, %v1125_v52  ;;  %v1197_v59 = vpop.f32.mrb[16].mxu1  ;;  %v1203_v23 = vmul.f32 0.5, %v1125_v52 }
 0x358   :  { %v1217_v60 = vadd.f32 %v1213_v55, %v979_v43  ;;  %v1210_v61 = vmul.f32 %v1206_v56, %v1052_v48  ;;  %v1198_v62 = vadd.f32 %v1317_v6, %v1197_v59  ;;  %v1441_v0 = vpop.f32.mrb[17].mxu1 }
 0x359   :  { %v1211_v1 = vmul.f32 %v1207_v57, %v1125_v52 }
 0x35a   :  { %v1221_v2 = vmul.f32 0.7978846, %v1217_v60  ;;  %v1214_v3 = vmul.f32 0.044715, %v1210_v61  ;;  %v1208_v4 = vmul.f32 %v1198_v62, %v1198_v62  ;;  %v1204_v58 = vmul.f32 0.5, %v1198_v62 }
 0x35b   :  { %v1215_v5 = vmul.f32 0.044715, %v1211_v1 }
 0x35c   :  { %1498 = vtanh.f32 %v1221_v2  ;;  %v1218_v7 = vadd.f32 %v1214_v3, %v1052_v48  ;;  %v1212_v8 = vmul.f32 %v1208_v4, %v1198_v62 }
 0x35d   :  { %v1219_v9 = vadd.f32 %v1215_v5, %v1125_v52 }
 0x35e   :  { %v1222_v10 = vmul.f32 0.7978846, %v1218_v7  ;;  %v1216_v11 = vmul.f32 0.044715, %v1212_v8 }
 0x35f   :  { %v1223_v12 = vmul.f32 0.7978846, %v1219_v9 }
 0x360   :  { %1500 = vtanh.f32 %v1222_v10  ;;  %v1220_v13 = vadd.f32 %v1216_v11, %v1198_v62 }
 0x361   :  { %1502 = vtanh.f32 %v1223_v12 }
 0x362   :  { %v1224_v14 = vmul.f32 0.7978846, %v1220_v13 }
 0x364   :  { %1504 = vtanh.f32 %v1224_v14 }
 0x366   :  { %v1499_v15 = vpop.eup %1498 }
 0x367   :  { %v1229_v17 = vadd.f32 1.0, %v1499_v15 }
 0x369   :  { %v1233_v18 = vmul.f32 %v1229_v17, %v1201_v16 }
 0x36a   :  { %v1501_v19 = vpop.eup %1500 }
 0x36b   :  { %v1503_v20 = vpop.eup %1502  ;;  %v1230_v22 = vadd.f32 1.0, %v1501_v19  ;;  %1238 = vst.msk [vmem:[#allocation13] sm:$0xff] %vm1237_vm4, %v1233_v18 }
 0x36c   :  { %v1231_v24 = vadd.f32 1.0, %v1503_v20 }
 0x36d   :  { %v1234_v25 = vmul.f32 %v1230_v22, %v1202_v21 }
 0x36e   :  { %v1505_v49 = vpop.eup %1504  ;;  %v1235_v54 = vmul.f32 %v1231_v24, %v1203_v23 }
 0x36f   :  { %v1232_v63 = vadd.f32 1.0, %v1505_v49  ;;  %1239 = vst.msk [vmem:[#allocation13 + $0x8] sm:$0xff] %vm1237_vm4, %v1234_v25 }
 0x370   :  { %1240 = vst.msk [vmem:[#allocation13 + $0x10] sm:$0xff] %vm1237_vm4, %v1235_v54 }
 0x371   :  { %v1236_v26 = vmul.f32 %v1232_v63, %v1204_v58 }
 0x373   :  { %1241 = vst.msk [vmem:[#allocation13 + $0x18] sm:$0xff] %vm1237_vm4, %v1236_v26 }
 0x374   :  { %1671 = shalt.err (!%p1668_p4)
}
 0x375   :  { %s1672_s26 = scalar_lea.hbm %s1957_s6, 512 }
 0x376   :  { %p1673_p5 = scmp.ne.s32.totalorder %s1957_s6, %s1672_s26  ;;  %p1676_p6 = scmp.lt.u32.totalorder %s1672_s26, %s1957_s6 }
 0x378   :  { %p1678_p7 = pnand %p1676_p6, %p1673_p5 }
 0x37a   :  { %1681 = shalt.err (!%p1678_p7)
}
 0x37b   :  { %1257 = dma.vmem_to_hbm [thread:$0]  %s1252_s2, 512, %s1957_s6, [#allocation4], %s1698_s1, %s1698_s1, %s1699_s25  }
 0x37c   :  { %1690 = dma.done.wait [#allocation4], 512  }
 0x37d   :  { %1691 = vsyncadd [#allocation4], 4294966784 }
 0x37e   :  { %1692 = dma.done.wait [#allocation15], 128  }
 0x37f   :  { %1693 = vsyncadd [#allocation15], 4294967168 }
 0x380   :  { %1274 = vsyncpa [#allocation3], 1 }
 0x381   :  { %1275 = vsyncpa [#allocation6], 1 }
 0x382   :  { %1276 = vsyncpa [#allocation9], 1 }
 0x383   :  { %1277 = vsyncpa [#allocation12], 1 }
 0x384   :  { %1278 = vsyncpa [#allocation4], 1 }
 0x385   :  { %1279 = vsyncpa [#allocation15], 1 }

</bundles_post_ra>
